<compile_context>
chip_gen: v6e
topology: v6e:2x2x1
jax: 0.10.0
libtpu: 0.0.40
codegen_flags: <defaults>
</compile_context>

<pallas_src>
import jax
import jax.numpy as jnp
import numpy as np
from jax.experimental import pallas as pl
from jax.experimental.pallas import tpu as pltpu


def _round_up(x, m):
    return ((x + m - 1) // m) * m


def q_mlp_kernel(x_ref, w1_ref, b1_ref, w2_ref, b2_ref, w3_ref, b3_ref, out_ref):
    """Batch-on-lanes MLP: activations are (H, tb); output is a lane-dense (1, tb) row."""
    prec = jax.lax.Precision.HIGHEST  # f32-exact matmul parity with PyTorch semantics

    # Layer 1: (H, S+A) @ (S+A, tb) + (H, 1) -> (H, tb), ReLU
    h1 = jnp.dot(w1_ref[...], x_ref[...],
                 preferred_element_type=jnp.float32, precision=prec)
    h1 = jnp.maximum(h1 + b1_ref[...], 0.0)

    # Layer 2: (H, H) @ (H, tb) + (H, 1) -> (H, tb), ReLU
    h2 = jnp.dot(w2_ref[...], h1,
                 preferred_element_type=jnp.float32, precision=prec)
    h2 = jnp.maximum(h2 + b2_ref[...], 0.0)

    # Output layer: VPU multiply by the (H, 1) weight column + sublane reduction
    # -> (1, tb) lane-dense row; b3 is an SMEM scalar added on the scalar path.
    q = jnp.sum(h2 * w3_ref[...], axis=0, keepdims=True)
    out_ref[...] = (q + b3_ref[0, 0]).astype(out_ref.dtype)


def q_forward(state, action, params, *, tb=None):
    """state: [B, state_dim], action: [B, action_dim] -> [B, 1] (float32)."""
    w1, b1, w2, b2, w3, b3 = params
    B, S = state.shape
    A = action.shape[1]
    H, D = w1.shape
    assert D == S + A

    # One small concat in the wrapper, then batch-on-lanes transpose: (S+A, B).
    x_t = jnp.concatenate([state, action], axis=-1).T

    # Batch tile along lanes. Default: one grid step covering the whole batch
    # (per-step compute is tiny, so grid-step overhead would dominate otherwise).
    if tb is None:
        tb = _round_up(B, 128)
    else:
        tb = _round_up(max(tb, 128), 128)
    bp = _round_up(B, tb)
    if bp != B:
        x_t = jnp.pad(x_t, ((0, 0), (0, bp - B)))
    grid = (bp // tb,)

    # Weights/biases: constant index_maps -> resident in VMEM across grid steps.
    resident = lambda shape: pl.BlockSpec(shape, lambda i: (0, 0))

    out = pl.pallas_call(
        q_mlp_kernel,
        out_shape=jax.ShapeDtypeStruct((1, bp), jnp.float32),
        grid=grid,
        in_specs=[
            pl.BlockSpec((D, tb), lambda i: (0, i)),            # x tile (features x batch)
            resident((H, D)),                                   # W1
            resident((H, 1)),                                   # b1 column
            resident((H, H)),                                   # W2
            resident((H, 1)),                                   # b2 column
            resident((H, 1)),                                   # w3 column (final Linear weight^T)
            pl.BlockSpec(memory_space=pltpu.MemorySpace.SMEM),  # b3 scalar
        ],
        out_specs=pl.BlockSpec((1, tb), lambda i: (0, i)),      # lane-dense output row
        compiler_params=pltpu.CompilerParams(
            dimension_semantics=("arbitrary",)),
    )(x_t, w1, b1, w2, b2, w3, b3)

    # Padded batch columns hold junk (ReLU(b) propagated); slice them off.
    return out[0, :B][:, None]


def init_params(key, state_dim, action_dim, hidden_dim):
    """Deterministic init mimicking nn.Linear default (uniform +/- 1/sqrt(fan_in)).

    Weights are stored in PyTorch layout (out_features, in_features), which is
    exactly what the transposed (batch-on-lanes) kernel consumes. The final
    layer's (1, H) weight is stored as an (H, 1) column for the VPU reduction.
    """
    d_in = state_dim + action_dim
    ks = jax.random.split(key, 6)

    def lin(kw, kb, fan_in, fan_out):
        bound = 1.0 / float(np.sqrt(fan_in))
        w = jax.random.uniform(kw, (fan_out, fan_in), jnp.float32, -bound, bound)
        b = jax.random.uniform(kb, (fan_out, 1), jnp.float32, -bound, bound)
        return w, b

    w1, b1 = lin(ks[0], ks[1], d_in, hidden_dim)        # (H, S+A), (H, 1)
    w2, b2 = lin(ks[2], ks[3], hidden_dim, hidden_dim)  # (H, H),   (H, 1)
    w3_row, b3 = lin(ks[4], ks[5], hidden_dim, 1)       # (1, H),   (1, 1)
    w3 = w3_row.T                                       # (H, 1) column
    return (w1, b1, w2, b2, w3, b3)


if __name__ == "__main__":
    state_dim, action_dim, hidden_dim = 16, 16, 32
    batch = 256

    key = jax.random.PRNGKey(0)
    k_params, k_state, k_action = jax.random.split(key, 3)

    params = init_params(k_params, state_dim, action_dim, hidden_dim)
    state = jax.random.normal(k_state, (batch, state_dim), jnp.float32)
    action = jax.random.normal(k_action, (batch, action_dim), jnp.float32)

    out = q_forward(state, action, params)
    out = jax.block_until_ready(out)

    # Pure-numpy f32 reference (concat + three Linear layers, PyTorch semantics).
    w1, b1, w2, b2, w3, b3 = (np.asarray(p) for p in params)
    x = np.concatenate([np.asarray(state), np.asarray(action)], axis=-1)
    ref = np.maximum(x @ w1.T + b1.T, 0.0)
    ref = np.maximum(ref @ w2.T + b2.T, 0.0)
    ref = ref @ w3 + b3[0, 0]

    assert out.shape == (batch, 1)
    assert np.allclose(np.asarray(out), ref, atol=1e-4, rtol=1e-4)

    print("KERNEL_OK")
</pallas_src>

<mosaic_0001>
module attributes {stable_mosaic.version = 11 : i64} {
  func.func @q_mlp_kernel(%arg0: i32, %arg1: memref<32x256xf32, #tpu.memory_space<vmem>>, %arg2: memref<32x32xf32, #tpu.memory_space<vmem>>, %arg3: memref<32x1xf32, #tpu.memory_space<vmem>>, %arg4: memref<32x32xf32, #tpu.memory_space<vmem>>, %arg5: memref<32x1xf32, #tpu.memory_space<vmem>>, %arg6: memref<32x1xf32, #tpu.memory_space<vmem>>, %arg7: memref<1x1xf32, #tpu.memory_space<smem>>, %arg8: memref<1x256xf32, #tpu.memory_space<vmem>>) attributes {dimension_semantics = [#tpu.dimension_semantics<arbitrary>], iteration_bounds = array<i64: 1>, scalar_prefetch = 0 : i64, scratch_operands = 0 : i64, tpu.core_type = #tpu.core_type<tc>, window_params = [{transform_indices = @transform_0, window_bounds = array<i64: 32, 256>}, {pipeline_mode = #tpu.pipeline_mode<synchronous>, transform_indices = @transform_1, window_bounds = array<i64: 32, 32>}, {pipeline_mode = #tpu.pipeline_mode<synchronous>, transform_indices = @transform_2, window_bounds = array<i64: 32, 1>}, {pipeline_mode = #tpu.pipeline_mode<synchronous>, transform_indices = @transform_3, window_bounds = array<i64: 32, 32>}, {pipeline_mode = #tpu.pipeline_mode<synchronous>, transform_indices = @transform_4, window_bounds = array<i64: 32, 1>}, {pipeline_mode = #tpu.pipeline_mode<synchronous>, transform_indices = @transform_5, window_bounds = array<i64: 32, 1>}, {transform_indices = @transform_6, window_bounds = array<i64: 1, 1>}, {transform_indices = @transform_7, window_bounds = array<i64: 1, 256>}]} {
    %c0 = arith.constant 0 : index
    %c0_0 = arith.constant 0 : index
    %0 = vector.load %arg2[%c0, %c0_0] : memref<32x32xf32, #tpu.memory_space<vmem>>, vector<32x32xf32>
    %c0_1 = arith.constant 0 : index
    %c0_2 = arith.constant 0 : index
    %1 = vector.load %arg1[%c0_1, %c0_2] : memref<32x256xf32, #tpu.memory_space<vmem>>, vector<32x256xf32>
    %cst = arith.constant dense<0.000000e+00> : vector<32x256xf32>
    %2 = tpu.matmul %0, %1, %cst {dimension_numbers = #tpu.dot_dimension_numbers<[1], [0], [0], [1], [0, 0, 1, 1], [], []>, precision = #tpu.contract_precision<fp32>} : vector<32x32xf32>, vector<32x256xf32>, vector<32x256xf32> -> vector<32x256xf32>
    %c0_3 = arith.constant 0 : index
    %c0_4 = arith.constant 0 : index
    %3 = vector.load %arg3[%c0_3, %c0_4] : memref<32x1xf32, #tpu.memory_space<vmem>>, vector<32x1xf32>
    %4 = vector.broadcast %3 : vector<32x1xf32> to vector<32x256xf32>
    %5 = arith.addf %2, %4 : vector<32x256xf32>
    %cst_5 = arith.constant 0.000000e+00 : f32
    %6 = vector.broadcast %cst_5 : f32 to vector<32x256xf32>
    %7 = arith.maximumf %5, %6 : vector<32x256xf32>
    %c0_6 = arith.constant 0 : index
    %c0_7 = arith.constant 0 : index
    %8 = vector.load %arg4[%c0_6, %c0_7] : memref<32x32xf32, #tpu.memory_space<vmem>>, vector<32x32xf32>
    %cst_8 = arith.constant dense<0.000000e+00> : vector<32x256xf32>
    %9 = tpu.matmul %8, %7, %cst_8 {dimension_numbers = #tpu.dot_dimension_numbers<[1], [0], [0], [1], [0, 0, 1, 1], [], []>, precision = #tpu.contract_precision<fp32>} : vector<32x32xf32>, vector<32x256xf32>, vector<32x256xf32> -> vector<32x256xf32>
    %c0_9 = arith.constant 0 : index
    %c0_10 = arith.constant 0 : index
    %10 = vector.load %arg5[%c0_9, %c0_10] : memref<32x1xf32, #tpu.memory_space<vmem>>, vector<32x1xf32>
    %11 = vector.broadcast %10 : vector<32x1xf32> to vector<32x256xf32>
    %12 = arith.addf %9, %11 : vector<32x256xf32>
    %cst_11 = arith.constant 0.000000e+00 : f32
    %13 = vector.broadcast %cst_11 : f32 to vector<32x256xf32>
    %14 = arith.maximumf %12, %13 : vector<32x256xf32>
    %c0_12 = arith.constant 0 : index
    %c0_13 = arith.constant 0 : index
    %15 = vector.load %arg6[%c0_12, %c0_13] : memref<32x1xf32, #tpu.memory_space<vmem>>, vector<32x1xf32>
    %16 = vector.broadcast %15 : vector<32x1xf32> to vector<32x256xf32>
    %17 = arith.mulf %14, %16 : vector<32x256xf32>
    %cst_14 = arith.constant dense<0.000000e+00> : vector<256xf32>
    %18 = vector.multi_reduction <add>, %17, %cst_14 [0] : vector<32x256xf32> to vector<256xf32>
    %19 = vector.shape_cast %18 : vector<256xf32> to vector<1x256xf32>
    %c0_15 = arith.constant 0 : index
    %c0_16 = arith.constant 0 : index
    %20 = memref.load %arg7[%c0_15, %c0_16] : memref<1x1xf32, #tpu.memory_space<smem>>
    %21 = vector.broadcast %20 : f32 to vector<1x256xf32>
    %22 = arith.addf %19, %21 : vector<1x256xf32>
    %c0_17 = arith.constant 0 : index
    %c0_18 = arith.constant 0 : index
    %23 = vector.load %arg8[%c0_17, %c0_18] : memref<1x256xf32, #tpu.memory_space<vmem>>, vector<1x256xf32>
    tpu.vector_store %arg8[%c0_17, %c0_18], %22 {strides = array<i32>} : memref<1x256xf32, #tpu.memory_space<vmem>>, vector<1x256xf32>,
    return
  }
  func.func @transform_0(%arg0: i32) -> (i32, i32) {
    %c0_i32 = arith.constant 0 : i32
    %c0_i32_0 = arith.constant 0 : i32
    return %c0_i32, %arg0 : i32, i32
  }
  func.func @transform_1(%arg0: i32) -> (i32, i32) {
    %c0_i32 = arith.constant 0 : i32
    %c0_i32_0 = arith.constant 0 : i32
    %c0_i32_1 = arith.constant 0 : i32
    return %c0_i32, %c0_i32_0 : i32, i32
  }
  func.func @transform_2(%arg0: i32) -> (i32, i32) {
    %c0_i32 = arith.constant 0 : i32
    %c0_i32_0 = arith.constant 0 : i32
    %c0_i32_1 = arith.constant 0 : i32
    return %c0_i32, %c0_i32_0 : i32, i32
  }
  func.func @transform_3(%arg0: i32) -> (i32, i32) {
    %c0_i32 = arith.constant 0 : i32
    %c0_i32_0 = arith.constant 0 : i32
    %c0_i32_1 = arith.constant 0 : i32
    return %c0_i32, %c0_i32_0 : i32, i32
  }
  func.func @transform_4(%arg0: i32) -> (i32, i32) {
    %c0_i32 = arith.constant 0 : i32
    %c0_i32_0 = arith.constant 0 : i32
    %c0_i32_1 = arith.constant 0 : i32
    return %c0_i32, %c0_i32_0 : i32, i32
  }
  func.func @transform_5(%arg0: i32) -> (i32, i32) {
    %c0_i32 = arith.constant 0 : i32
    %c0_i32_0 = arith.constant 0 : i32
    %c0_i32_1 = arith.constant 0 : i32
    return %c0_i32, %c0_i32_0 : i32, i32
  }
  func.func @transform_6(%arg0: i32) -> (i32, i32) {
    %c0_i32 = arith.constant 0 : i32
    %c0_i32_0 = arith.constant 0 : i32
    %c0_i32_1 = arith.constant 0 : i32
    return %c0_i32, %c0_i32_0 : i32, i32
  }
  func.func @transform_7(%arg0: i32) -> (i32, i32) {
    %c0_i32 = arith.constant 0 : i32
    %c0_i32_0 = arith.constant 0 : i32
    return %c0_i32, %arg0 : i32, i32
  }
}

</mosaic_0001>

<bundles_post_ra>
// kernel: tpu_custom_call.1
= control target key start
LH: loop header
LB: loop body
LE: loop exit
PB: predicated region body
PF: predicated region fallthrough
CT: control target
= control target key end

     0   :  { %13 = vsyncpa [#allocation4], 0  ;;  %s2208_s0 = inlined_call_operand.vmem [shape: f32[32,256], index: 0, kind: input, shape index: {}]   ;;  %s2209_s1 = inlined_call_operand.vmem [shape: f32[32,32], index: 1, kind: input, shape index: {}]   ;;  %s2210_s2 = inlined_call_operand.vmem [shape: f32[32,1], index: 2, kind: input, shape index: {}]   ;;  %s2211_s3 = inlined_call_operand.hbm [shape: f32[32,32], index: 3, kind: input, shape index: {}]   ;;  %s2212_s4 = inlined_call_operand.vmem [shape: f32[32,1], index: 4, kind: input, shape index: {}]   ;;  %s2213_s5 = inlined_call_operand.vmem [shape: f32[32,1], index: 5, kind: input, shape index: {}]   ;;  %s2214_s6 = inlined_call_operand.<no memory space> [shape: f32[1,1], index: 6, kind: input, shape index: {}]   ;;  %s2215_s7 = inlined_call_operand.hbm [shape: f32[1,256], index: 7, kind: output, shape index: {}]  }
   0x1   :  { %14 = vsyncpa [#allocation5], 0  ;;  %s1672_s24 = smov [#allocation3]  }
   0x2   :  { %s26_s25 = sshll.u32 %s1672_s24, 4  ;;  %s27_s25 = int_to_ptr.vmem [resolvable:$true] %s26_s25 }
   0x3   :  { %s1636_s26 = scalar_lea.vmem %s27_s25, 512  ;;  %p1641_p1 = scmp.lt.s32.totalorder %s27_s25, %s27_s25 }
   0x4   :  { %p1637_p0 = scmp.ne.s32.totalorder %s27_s25, %s1636_s26  ;;  %p1642_p2 = scmp.lt.s32.totalorder %s1636_s26, %s1636_s26 }
   0x6   :  { %p1643_p3 = por %p1642_p2, %p1641_p1 }
   0x8   :  { %p1644_p4 = pnand %p1643_p3, %p1637_p0 }
   0xa   :  { %1647 = shalt.err (!%p1644_p4)
}
   0xb   :  { %s1673_s27 = smov 128   ;;  %s1674_s28 = smov 8  }
   0xc   :  { %32 = dma.hbm_to_vmem [thread:$0]  %s2211_s3, 512, %s27_s25, [#allocation4], %s1673_s27, %s1673_s27, %s1674_s28  }
   0xd   :  { %1668 = dma.done.wait [#allocation4], 512  }
   0xe   :  { %1669 = vsyncadd [#allocation4], 4294966784  ;;  %v1675_v0 = vmov 0.0   ;;  %v1676_v1 = vmov 0   ;;  %v53_v2 = vld [vmem:[%s2208_s0 + $0x38] sm:$0xff]  ;;  %v52_v3 = vld [vmem:[%s2208_s0 + $0x30] sm:$0xff] }
   0xf   :  { %163 = vmatprep.mubr.f32.mxu0 %v1675_v0  ;;  %312 = vmatprep.mubr.f32.mxu1 %v1675_v0  ;;  %v51_v4 = vld [vmem:[%s2208_s0 + $0x28] sm:$0xff]  ;;  %vm78_vm0 = vcmask 261120   ;;  %v1733_v5 = vand.u32 4294901760, %v53_v2  ;;  %v1735_v6 = vand.u32 4294901760, %v52_v3  ;;  %v50_v8 = vld [vmem:[%s2208_s0 + $0x20] sm:$0xff]  ;;  %v49_v9 = vld [vmem:[%s2208_s0 + $0x18] sm:$0xff] }
  0x10   :  { %1627 = vset.pattern.permute.xlu1 %v1676_v1  ;;  %1626 = vset.pattern.permute.xlu0 %v1676_v1  ;;  %v1737_v7 = vand.u32 4294901760, %v51_v4  ;;  %v48_v10 = vld [vmem:[%s2208_s0 + $0x10] sm:$0xff]  ;;  %v1748_v11 = vand.u32 4294901760, %v50_v8  ;;  %v1750_v12 = vand.u32 4294901760, %v49_v9  ;;  %v47_v14 = vld [vmem:[%s2208_s0 + $0x8] sm:$0xff]  ;;  %v46_v15 = vld [vmem:[%s2208_s0] sm:$0xff] }
  0x11   :  { %v1752_v13 = vand.u32 4294901760, %v48_v10  ;;  %v42_v16 = vld [vmem:[%s2209_s1] sm:$0xff]  ;;  %116 = vmatprep.subr.mxu0 %v1733_v5  ;;  %v1764_v17 = vand.u32 4294901760, %v47_v14  ;;  %v1766_v18 = vand.u32 4294901760, %v46_v15  ;;  %v1769_v19 = vsub.f32 %v53_v2, %v1733_v5  ;;  %v43_v21 = vld [vmem:[%s2209_s1 + $0x8] sm:$0xff]  ;;  %v57_v27 = vld [vmem:[%s2210_s2 + $0x18] sm:$0xff] }
  0x12   :  { %v80_v20 = vsel %vm78_vm0, %v42_v16, 0  ;;  %118 = vmatpush1.msra.mxu0 %v1735_v6  ;;  %v1779_v23 = vsub.f32 %v52_v3, %v1735_v6  ;;  %v1782_v24 = vsub.f32 %v51_v4, %v1737_v7  ;;  %v1785_v25 = vsub.f32 %v50_v8, %v1748_v11  ;;  %v55_v26 = vld [vmem:[%s2210_s2 + $0x8] sm:$0xff]  ;;  %v54_v36 = vld [vmem:[%s2210_s2] sm:$0xff]  ;;  %75 = vperm.xlu0 %1626, %v57_v27   ;;  %v56_v41 = vld [vmem:[%s2210_s2 + $0x10] sm:$0xff]  ;;  %s1678_s27 = smov [#allocation6]  }
  0x13   :  { %v1776_v22 = vand.u32 4294901760, %v80_v20  ;;  %120 = vmatprep.subr.mxu0 %v1737_v7  ;;  %v234_v28 = vand.u32 4294901760, %v1769_v19  ;;  %v1796_v29 = vsub.f32 %v49_v9, %v1750_v12  ;;  %v83_v30 = vsel %vm78_vm0, %v43_v21, 0  ;;  %65 = vperm.xlu1 %1627, %v55_v26   ;;  %v44_v50 = vld [vmem:[%s2209_s1 + $0x10] sm:$0xff]  ;;  %v45_v51 = vld [vmem:[%s2209_s1 + $0x18] sm:$0xff]  ;;  %v794_v56 = vld [vmem:[%s2212_s4 + $0x8] sm:$0xff] }
  0x14   :  { %v1800_v31 = vsub.f32 %v48_v10, %v1752_v13  ;;  %122 = vmatpush1.msra.mxu0 %v1748_v11  ;;  %v240_v33 = vand.u32 4294901760, %v1779_v23  ;;  %v246_v34 = vand.u32 4294901760, %v1782_v24  ;;  %v252_v35 = vand.u32 4294901760, %v1785_v25  ;;  %v793_v10 = vld [vmem:[%s2212_s4] sm:$0xff]  ;;  %v796_v21 = vld [vmem:[%s2212_s4 + $0x18] sm:$0xff]  ;;  %s1610_s28 = sshll.u32 %s1678_s27, 4  ;;  %s1611_s28 = int_to_ptr.vmem [resolvable:$true] %s1610_s28 }
  0x15   :  { %v1804_v32 = vsub.f32 %v80_v20, %v1776_v22  ;;  %124 = vmatprep.subr.mxu0 %v1750_v12  ;;  %v235_v37 = vsub.f32 %v1769_v19, %v234_v28  ;;  %v258_v38 = vand.u32 4294901760, %v1796_v29  ;;  %v1817_v39 = vand.u32 4294901760, %v83_v30  ;;  %s1648_s29 = scalar_lea.vmem %s1611_s28, 32  ;;  %p1653_p6 = scmp.lt.s32.totalorder %s1611_s28, %s1611_s28 }
  0x16   :  { %v264_v40 = vand.u32 4294901760, %v1800_v31  ;;  %126 = vmatpush1.msra.mxu0 %v1752_v13  ;;  %v241_v43 = vsub.f32 %v1779_v23, %v240_v33  ;;  %v247_v44 = vsub.f32 %v1782_v24, %v246_v34  ;;  %v253_v45 = vsub.f32 %v1785_v25, %v252_v35  ;;  %70 = vperm.xlu0 %1626, %v56_v41   ;;  %p1649_p5 = scmp.ne.s32.totalorder %s1611_s28, %s1648_s29  ;;  %p1654_p7 = scmp.lt.s32.totalorder %s1648_s29, %s1648_s29 }
  0x17   :  { %v166_v42 = vand.u32 4294901760, %v1804_v32  ;;  %128 = vmatprep.subr.mxu0 %v1764_v17  ;;  %v236_v46 = vand.u32 4294901760, %v235_v37  ;;  %v259_v47 = vsub.f32 %v1796_v29, %v258_v38  ;;  %v1839_v48 = vsub.f32 %v83_v30, %v1817_v39  ;;  %60 = vperm.xlu1 %1627, %v54_v36  }
  0x18   :  { %v265_v49 = vsub.f32 %v1800_v31, %v264_v40  ;;  %130 = vmatpush1.msra.mxu0 %v1766_v18  ;;  %v242_v53 = vand.u32 4294901760, %v241_v43  ;;  %v248_v54 = vand.u32 4294901760, %v247_v44  ;;  %v254_v55 = vand.u32 4294901760, %v253_v45  ;;  %p1655_p8 = por %p1654_p7, %p1653_p6 }
  0x19   :  { %v167_v52 = vsub.f32 %v1804_v32, %v166_v42  ;;  %237 = vmatprep.subr.mxu1 %v236_v46  ;;  %v260_v57 = vand.u32 4294901760, %v259_v47  ;;  %v177_v58 = vand.u32 4294901760, %v1839_v48  ;;  %v1859_v60 = vsub.f32 %v47_v14, %v1764_v17  ;;  %367 = vmatprep.subr.mxu0 %v1769_v19 }
  0x1a   :  { %v266_v59 = vand.u32 4294901760, %v265_v49  ;;  %243 = vmatpush1.msra.mxu1 %v242_v53  ;;  %v1863_v62 = vsub.f32 %v46_v15, %v1766_v18  ;;  %v86_v63 = vsel %vm78_vm0, %v44_v50, 0  ;;  %v89_v1 = vsel %vm78_vm0, %v45_v51, 0  ;;  %799 = vperm.xlu0 %1626, %v793_v10   ;;  %p1656_p9 = pnand %p1655_p8, %p1649_p5 }
  0x1b   :  { %v168_v61 = vand.u32 4294901760, %v167_v52  ;;  %249 = vmatprep.subr.mxu1 %v248_v54  ;;  %v178_v2 = vsub.f32 %v1839_v48, %v177_v58  ;;  %v270_v3 = vand.u32 4294901760, %v1859_v60  ;;  %v1871_v4 = vand.u32 4294901760, %v86_v63  ;;  %804 = vperm.xlu1 %1627, %v794_v56  }
  0x1c   :  { %v1873_v8 = vand.u32 4294901760, %v89_v1  ;;  %255 = vmatpush1.msra.mxu1 %v254_v55  ;;  %v276_v9 = vand.u32 4294901760, %v1863_v62 }
  0x1d   :  { %169 = vmatmul.mubr.f32.vlgmr.msra.gmra.mxu0 %v168_v61  ;;  %261 = vmatprep.subr.mxu1 %v260_v57  ;;  %v179_v14 = vand.u32 4294901760, %v178_v2  ;;  %v271_v15 = vsub.f32 %v1859_v60, %v270_v3  ;;  %v1884_v16 = vsub.f32 %v86_v63, %v1871_v4  ;;  %v789_v2 = vld [vmem:[#allocation3] sm:$0xff] }
  0x1e   :  { %174 = vmatprep.mubr.f32.mxu0 %v1675_v0  ;;  %v1887_v20 = vsub.f32 %v89_v1, %v1873_v8  ;;  %267 = vmatpush1.msra.mxu1 %v266_v59  ;;  %v277_v26 = vsub.f32 %v1863_v62, %v276_v9 }
  0x1f   :  { %370 = vmatpush1.msra.mxu0 %v1779_v23  ;;  %v272_v27 = vand.u32 4294901760, %v271_v15  ;;  %v188_v30 = vand.u32 4294901760, %v1884_v16  ;;  %814 = vperm.xlu1 %1627, %v796_v21   ;;  %v818_v21 = vsel %vm78_vm0, %v789_v2, 0  ;;  %v790_v2 = vld [vmem:[#allocation3 + $0x8] sm:$0xff] }
  0x20   :  { %373 = vmatprep.subr.mxu0 %v1782_v24  ;;  %v199_v36 = vand.u32 4294901760, %v1887_v20  ;;  %v278_v37 = vand.u32 4294901760, %v277_v26 }
  0x21   :  { %180 = vmatmul.mubr.f32.gmra.mxu0 %v179_v14  ;;  %273 = vmatprep.subr.mxu1 %v272_v27  ;;  %v189_v41 = vsub.f32 %v1884_v16, %v188_v30 }
  0x22   :  { %185 = vmatprep.mubr.f32.mxu0 %v1675_v0  ;;  %v200_v43 = vsub.f32 %v1887_v20, %v199_v36  ;;  %279 = vmatpush1.msra.mxu1 %v278_v37 }
  0x23   :  { %376 = vmatpush1.msra.mxu0 %v1785_v25  ;;  %314 = vmatmul.mubr.f32.vlgmr.msra.gmra.mxu1 %v1776_v22  ;;  %v190_v44 = vand.u32 4294901760, %v189_v41 }
  0x24   :  { %379 = vmatprep.subr.mxu0 %v1796_v29  ;;  %319 = vmatprep.mubr.f32.mxu1 %v1675_v0  ;;  %v201_v45 = vand.u32 4294901760, %v200_v43 }
  0x25   :  { %382 = vmatpush1.msra.mxu0 %v1800_v31  ;;  %479 = vmatprep.subr.mxu1 %v1733_v5 }
  0x26   :  { %191 = vmatmul.mubr.f32.gmra.mxu0 %v190_v44  ;;  %385 = vmatprep.subr.mxu0 %v1859_v60 }
  0x27   :  { %196 = vmatprep.mubr.f32.mxu0 %v1675_v0  ;;  %388 = vmatpush1.msra.mxu0 %v1863_v62 }
  0x28   :  { %321 = vmatmul.mubr.f32.gmra.mxu1 %v1817_v39  ;;  %590 = vmatprep.subr.mxu0 %v234_v28 }
  0x29   :  { %326 = vmatprep.mubr.f32.mxu1 %v1675_v0  ;;  %481 = vmatpush1.msra.mxu1 %v1735_v6 }
  0x2a   :  { %202 = vmatmul.mubr.f32.gmra.mxu0 %v201_v45  ;;  %483 = vmatprep.subr.mxu1 %v1737_v7 }
  0x2b   :  { %421 = vmatprep.mubr.f32.mxu0 %v1675_v0  ;;  %485 = vmatpush1.msra.mxu1 %v1748_v11 }
  0x2c   :  { %328 = vmatmul.mubr.f32.gmra.mxu1 %v1871_v4  ;;  %487 = vmatprep.subr.mxu1 %v1750_v12 }
  0x2d   :  { %333 = vmatprep.mubr.f32.mxu1 %v1675_v0  ;;  %489 = vmatpush1.msra.mxu1 %v1752_v13 }
  0x2e   :  { %424 = vmatmul.mubr.f32.vlgmr.msra.gmra.mxu0 %v1804_v32  ;;  %491 = vmatprep.subr.mxu1 %v1764_v17 }
  0x2f   :  { %429 = vmatprep.mubr.f32.mxu0 %v1675_v0  ;;  %493 = vmatpush1.msra.mxu1 %v1766_v18 }
  0x30   :  { %335 = vmatmul.mubr.f32.gmra.mxu1 %v1873_v8  ;;  %594 = vmatpush1.msra.mxu0 %v240_v33 }
  0x31   :  { %526 = vmatprep.mubr.f32.mxu1 %v1675_v0  ;;  %598 = vmatprep.subr.mxu0 %v246_v34 }
  0x32   :  { %432 = vmatmul.mubr.f32.gmra.mxu0 %v1839_v48  ;;  %705 = vmatprep.subr.mxu1 %v1733_v5  ;;  %v795_v5 = vld [vmem:[%s2212_s4 + $0x10] sm:$0xff] }
  0x33   :  { %437 = vmatprep.mubr.f32.mxu0 %v1675_v0  ;;  %602 = vmatpush1.msra.mxu0 %v252_v35 }
  0x34   :  { %530 = vmatmul.mubr.f32.vlgmr.msra.gmra.mxu1 %v166_v42  ;;  %606 = vmatprep.subr.mxu0 %v258_v38 }
  0x35   :  { %535 = vmatprep.mubr.f32.mxu1 %v1675_v0  ;;  %610 = vmatpush1.msra.mxu0 %v264_v40 }
  0x36   :  { %440 = vmatmul.mubr.f32.gmra.mxu0 %v1884_v16  ;;  %614 = vmatprep.subr.mxu0 %v270_v3 }
  0x37   :  { %445 = vmatprep.mubr.f32.mxu0 %v1675_v0  ;;  %618 = vmatpush1.msra.mxu0 %v276_v9 }
  0x38   :  { %539 = vmatmul.mubr.f32.gmra.mxu1 %v177_v58  ;;  %809 = vperm.xlu0 %1626, %v795_v5  }
  0x39   :  { %544 = vmatprep.mubr.f32.mxu1 %v1675_v0  ;;  %707 = vmatpush1.msra.mxu1 %v1735_v6  ;;  %v1528_v6 = vld [vmem:[%s2213_s5 + $0x8] sm:$0xff] }
  0x3a   :  { %448 = vmatmul.mubr.f32.gmra.mxu0 %v1887_v20  ;;  %709 = vmatprep.subr.mxu1 %v1737_v7  ;;  %v1527_v7 = vld [vmem:[%s2213_s5] sm:$0xff] }
  0x3b   :  { %651 = vmatprep.mubr.f32.mxu0 %v1675_v0  ;;  %711 = vmatpush1.msra.mxu1 %v1748_v11  ;;  %v1530_v11 = vld [vmem:[%s2213_s5 + $0x18] sm:$0xff] }
  0x3c   :  { %548 = vmatmul.mubr.f32.gmra.mxu1 %v188_v30  ;;  %713 = vmatprep.subr.mxu1 %v1750_v12  ;;  %v1529_v12 = vld [vmem:[%s2213_s5 + $0x10] sm:$0xff] }
  0x3d   :  { %553 = vmatprep.mubr.f32.mxu1 %v1675_v0  ;;  %715 = vmatpush1.msra.mxu1 %v1752_v13 }
  0x3e   :  { %653 = vmatmul.mubr.f32.vlgmr.msra.gmra.mxu0 %v1776_v22  ;;  %717 = vmatprep.subr.mxu1 %v1764_v17 }
  0x3f   :  { %658 = vmatprep.mubr.f32.mxu0 %v1675_v0  ;;  %719 = vmatpush1.msra.mxu1 %v1766_v18 }
  0x40   :  { %557 = vmatmul.mubr.f32.gmra.mxu1 %v199_v36  ;;  %1538 = vperm.xlu1 %1627, %v1528_v6   ;;  %v2001_v6 = vand.u32 4294901760, %v818_v21 }
  0x41   :  { %752 = vmatprep.mubr.f32.mxu1 %v1675_v0  ;;  %1533 = vperm.xlu0 %1626, %v1527_v7  }
  0x42   :  { %660 = vmatmul.mubr.f32.gmra.mxu0 %v1817_v39 }
  0x43   :  { %665 = vmatprep.mubr.f32.mxu0 %v1675_v0 }
  0x44   :  { %754 = vmatmul.mubr.f32.vlgmr.msra.gmra.mxu1 %v1776_v22  ;;  %1548 = vperm.xlu1 %1627, %v1530_v11  }
  0x45   :  { %759 = vmatprep.mubr.f32.mxu1 %v1675_v0  ;;  %1543 = vperm.xlu0 %1626, %v1529_v12  }
  0x46   :  { %667 = vmatmul.mubr.f32.gmra.mxu0 %v1871_v4 }
  0x47   :  { %672 = vmatprep.mubr.f32.mxu0 %v1675_v0 }
  0x48   :  { %761 = vmatmul.mubr.f32.gmra.mxu1 %v1817_v39 }
  0x49   :  { %766 = vmatprep.mubr.f32.mxu1 %v1675_v0 }
  0x4a   :  { %674 = vmatmul.mubr.f32.gmra.mxu0 %v1873_v8 }
  0x4b   :  { %901 = vmatprep.mubr.f32.mxu0 %v1675_v0 }
  0x4c   :  { %768 = vmatmul.mubr.f32.gmra.mxu1 %v1871_v4 }
  0x4d   :  { %773 = vmatprep.mubr.f32.mxu1 %v1675_v0 }
  0x50   :  { %775 = vmatmul.mubr.f32.gmra.mxu1 %v1873_v8 }
  0x51   :  { %1050 = vmatprep.mubr.f32.mxu1 %v1675_v0 }
  0x8d   :  { %v76_v52 = vpop.permute.xlu0 %75 }
  0x8e   :  { %v66_v55 = vpop.permute.xlu1 %65 }
  0x91   :  { %v71_v60 = vpop.permute.xlu0 %70 }
  0x92   :  { %v61_v1 = vpop.permute.xlu1 %60 }
  0xdd   :  { %v170_v13 = vpop.f32.mrf.mxu0 }
  0xde   :  { %v171_v10 = vadd.f32 %v170_v13, %v61_v1 }
  0xdf   :  { %v172_v17 = vpop.f32.mrf.mxu0 }
  0xe0   :  { %v173_v14 = vadd.f32 %v172_v17, %v61_v1 }
  0xe1   :  { %v181_v18 = vpop.f32.mrf.mxu0 }
  0xe2   :  { %v182_v63 = vadd.f32 %v181_v18, %v66_v55 }
  0xe3   :  { %v183_v19 = vpop.f32.mrf.mxu0  ;;  %v315_v22 = vpop.f32.mrf.mxu1 }
  0xe4   :  { %v184_v3 = vadd.f32 %v183_v19, %v66_v55  ;;  %v316_v7 = vadd.f32 %v315_v22, %v171_v10 }
  0xe5   :  { %v317_v24 = vpop.f32.mrf.mxu1 }
  0xe6   :  { %v192_v23 = vpop.f32.mrf.mxu0  ;;  %v318_v36 = vadd.f32 %v317_v24, %v173_v14  ;;  %v2005_v14 = vsub.f32 %v818_v21, %v2001_v6 }
  0xe7   :  { %v193_v4 = vadd.f32 %v192_v23, %v71_v60 }
  0xe8   :  { %v194_v25 = vpop.f32.mrf.mxu0  ;;  %v322_v28 = vpop.f32.mrf.mxu1  ;;  %v904_v21 = vand.u32 4294901760, %v2005_v14 }
  0xe9   :  { %v323_v26 = vadd.f32 %v322_v28, %v182_v63  ;;  %v195_v30 = vadd.f32 %v194_v25, %v71_v60 }
  0xea   :  { %v203_v29 = vpop.f32.mrf.mxu0  ;;  %v324_v31 = vpop.f32.mrf.mxu1 }
  0xeb   :  { %v325_v15 = vadd.f32 %v324_v31, %v184_v3  ;;  %v204_v27 = vadd.f32 %v203_v29, %v76_v52 }
  0xec   :  { %v205_v32 = vpop.f32.mrf.mxu0  ;;  %v329_v33 = vpop.f32.mrf.mxu1 }
  0xed   :  { %v330_v37 = vadd.f32 %v329_v33, %v193_v4  ;;  %v206_v19 = vadd.f32 %v205_v32, %v76_v52 }
  0xee   :  { %v425_v34 = vpop.f32.mrf.mxu0  ;;  %v331_v35 = vpop.f32.mrf.mxu1 }
  0xef   :  { %v332_v45 = vadd.f32 %v331_v35, %v195_v30  ;;  %v426_v25 = vadd.f32 %v425_v34, %v316_v7 }
  0xf0   :  { %v427_v38 = vpop.f32.mrf.mxu0  ;;  %v336_v39 = vpop.f32.mrf.mxu1 }
  0xf1   :  { %v428_v11 = vadd.f32 %v427_v38, %v318_v36  ;;  %v337_v23 = vadd.f32 %v336_v39, %v204_v27 }
  0xf2   :  { %v433_v40 = vpop.f32.mrf.mxu0  ;;  %v338_v42 = vpop.f32.mrf.mxu1 }
  0xf3   :  { %v434_v5 = vadd.f32 %v433_v40, %v323_v26  ;;  %v339_v35 = vadd.f32 %v338_v42, %v206_v19 }
  0xf4   :  { %v435_v46 = vpop.f32.mrf.mxu0  ;;  %v531_v47 = vpop.f32.mrf.mxu1 }
  0xf5   :  { %v436_v41 = vadd.f32 %v435_v46, %v325_v15  ;;  %v532_v22 = vadd.f32 %v531_v47, %v426_v25 }
  0xf6   :  { %v441_v48 = vpop.f32.mrf.mxu0  ;;  %v533_v49 = vpop.f32.mrf.mxu1 }
  0xf7   :  { %v442_v12 = vadd.f32 %v441_v48, %v330_v37  ;;  %v534_v24 = vadd.f32 %v533_v49, %v428_v11 }
  0xf8   :  { %v443_v50 = vpop.f32.mrf.mxu0  ;;  %v540_v51 = vpop.f32.mrf.mxu1 }
  0xf9   :  { %v444_v28 = vadd.f32 %v443_v50, %v332_v45  ;;  %v541_v29 = vadd.f32 %v540_v51, %v434_v5 }
  0xfa   :  { %v449_v53 = vpop.f32.mrf.mxu0  ;;  %v542_v54 = vpop.f32.mrf.mxu1 }
  0xfb   :  { %v543_v13 = vadd.f32 %v542_v54, %v436_v41  ;;  %v450_v40 = vadd.f32 %v449_v53, %v337_v23 }
  0xfc   :  { %v451_v56 = vpop.f32.mrf.mxu0  ;;  %v549_v57 = vpop.f32.mrf.mxu1 }
  0xfd   :  { %v550_v31 = vadd.f32 %v549_v57, %v442_v12  ;;  %v452_v32 = vadd.f32 %v451_v56, %v339_v35  ;;  %v792_v12 = vld [vmem:[#allocation3 + $0x18] sm:$0xff] }
  0xfe   :  { %v654_v58 = vpop.f32.mrf.mxu0  ;;  %v551_v59 = vpop.f32.mrf.mxu1 }
  0xff   :  { %v552_v60 = vadd.f32 %v551_v59, %v444_v28  ;;  %v655_v34 = vadd.f32 %v654_v58, %v532_v22  ;;  %v821_v59 = vsel %vm78_vm0, %v790_v2, 0 }
 0x100   :  { %v656_v61 = vpop.f32.mrf.mxu0  ;;  %v558_v62 = vpop.f32.mrf.mxu1  ;;  %v2007_v30 = vand.u32 4294901760, %v821_v59 }
 0x101   :  { %v657_v38 = vadd.f32 %v656_v61, %v534_v24  ;;  %v559_v39 = vadd.f32 %v558_v62, %v450_v40  ;;  %v905_v24 = vsub.f32 %v2005_v14, %v904_v21 }
 0x102   :  { %v661_v8 = vpop.f32.mrf.mxu0  ;;  %v560_v9 = vpop.f32.mrf.mxu1 }
 0x103   :  { %v662_v63 = vadd.f32 %v661_v8, %v541_v29  ;;  %v561_v4 = vadd.f32 %v560_v9, %v452_v32 }
 0x104   :  { %v663_v16 = vpop.f32.mrf.mxu0  ;;  %v755_v20 = vpop.f32.mrf.mxu1 }
 0x105   :  { %v664_v33 = vadd.f32 %v663_v16, %v543_v13  ;;  %v756_v47 = vadd.f32 %v755_v20, %v655_v34  ;;  %v791_v16 = vld [vmem:[#allocation3 + $0x10] sm:$0xff] }
 0x106   :  { %v668_v43 = vpop.f32.mrf.mxu0  ;;  %v757_v44 = vpop.f32.mrf.mxu1 }
 0x107   :  { %v669_v48 = vadd.f32 %v668_v43, %v550_v31  ;;  %v758_v49 = vadd.f32 %v757_v44, %v657_v38  ;;  %v781_v41 = vmax.f32 %v756_v47, 0.0  ;;  %v824_v44 = vsel %vm78_vm0, %v791_v16, 0 }
 0x108   :  { %v670_v17 = vpop.f32.mrf.mxu0  ;;  %v762_v18 = vpop.f32.mrf.mxu1  ;;  %v2037_v28 = vand.u32 4294901760, %v824_v44  ;;  %v827_v31 = vsel %vm78_vm0, %v792_v12, 0 }
 0x109   :  { %v671_v50 = vadd.f32 %v670_v17, %v552_v60  ;;  %v763_v51 = vadd.f32 %v762_v18, %v662_v63  ;;  %v782_v26 = vmax.f32 %v758_v49, 0.0  ;;  %v2027_v17 = vsub.f32 %v821_v59, %v2007_v30 }
 0x10a   :  { %v675_v46 = vpop.f32.mrf.mxu0  ;;  %v764_v55 = vpop.f32.mrf.mxu1  ;;  %v2039_v29 = vand.u32 4294901760, %v781_v41  ;;  %v2066_v38 = vsub.f32 %v824_v44, %v2037_v28 }
 0x10b   :  { %v765_v54 = vadd.f32 %v764_v55, %v664_v33  ;;  %v676_v42 = vadd.f32 %v675_v46, %v559_v39  ;;  %v783_v56 = vmax.f32 %v763_v51, 0.0  ;;  %v2024_v13 = vand.u32 4294901760, %v782_v26 }
 0x10c   :  { %v769_v1 = vpop.f32.mrf.mxu1  ;;  %v677_v52 = vpop.f32.mrf.mxu0  ;;  %v915_v60 = vand.u32 4294901760, %v2027_v17  ;;  %v906_v39 = vand.u32 4294901760, %v905_v24 }
 0x10d   :  { %v770_v57 = vadd.f32 %v769_v1, %v669_v48  ;;  %v784_v61 = vmax.f32 %v765_v54, 0.0  ;;  %v678_v62 = vadd.f32 %v677_v52, %v561_v4  ;;  %v2017_v45 = vand.u32 4294901760, %v783_v56 }
 0x10e   :  { %v771_v3 = vpop.f32.mrf.mxu1  ;;  %v2058_v40 = vsub.f32 %v782_v26, %v2024_v13  ;;  %v2068_v48 = vand.u32 4294901760, %v827_v31  ;;  %v2071_v54 = vsub.f32 %v781_v41, %v2039_v29  ;;  %v916_v34 = vsub.f32 %v2027_v17, %v915_v60 }
 0x10f   :  { %v772_v53 = vadd.f32 %v771_v3, %v671_v50  ;;  %v785_v8 = vmax.f32 %v770_v57, 0.0  ;;  %v2013_v43 = vand.u32 4294901760, %v784_v61  ;;  %v2049_v33 = vsub.f32 %v783_v56, %v2017_v45 }
 0x110   :  { %v776_v10 = vpop.f32.mrf.mxu1  ;;  %v1008_v49 = vand.u32 4294901760, %v2058_v40  ;;  %v926_v3 = vand.u32 4294901760, %v2066_v38  ;;  %v2095_v4 = vsub.f32 %v827_v31, %v2068_v48 }
 0x111   :  { %v786_v15 = vmax.f32 %v772_v53, 0.0  ;;  %v777_v58 = vadd.f32 %v776_v10, %v676_v42  ;;  %v2009_v9 = vand.u32 4294901760, %v785_v8  ;;  %v2042_v25 = vsub.f32 %v784_v61, %v2013_v43 }
 0x112   :  { %v778_v27 = vpop.f32.mrf.mxu1  ;;  %v1002_v32 = vand.u32 4294901760, %v2049_v33  ;;  %v1014_v42 = vand.u32 4294901760, %v2071_v54  ;;  %v1009_v10 = vsub.f32 %v2058_v40, %v1008_v49 }
 0x113   :  { %v2011_v36 = vand.u32 4294901760, %v786_v15  ;;  %v787_v20 = vmax.f32 %v777_v58, 0.0  ;;  %v779_v37 = vadd.f32 %v778_v27, %v678_v62  ;;  %v2030_v18 = vsub.f32 %v785_v8, %v2009_v9 }
 0x114   :  { %v996_v2 = vand.u32 4294901760, %v2042_v25  ;;  %v1003_v47 = vsub.f32 %v2049_v33, %v1002_v32  ;;  %v917_v8 = vand.u32 4294901760, %v916_v34  ;;  %v927_v62 = vsub.f32 %v2066_v38, %v926_v3 }
 0x115   :  { %v2020_v5 = vsub.f32 %v786_v15, %v2011_v36  ;;  %v2022_v7 = vand.u32 4294901760, %v787_v20  ;;  %v788_v11 = vmax.f32 %v779_v37, 0.0  ;;  %v990_v63 = vand.u32 4294901760, %v2030_v18 }
 0x116   :  { %v997_v59 = vsub.f32 %v2042_v25, %v996_v2  ;;  %v937_v15 = vand.u32 4294901760, %v2095_v4  ;;  %v1015_v58 = vsub.f32 %v2071_v54, %v1014_v42  ;;  %v1004_v26 = vand.u32 4294901760, %v1003_v47 }
 0x117   :  { %v2033_v19 = vsub.f32 %v787_v20, %v2022_v7  ;;  %v2035_v23 = vand.u32 4294901760, %v788_v11  ;;  %v984_v35 = vand.u32 4294901760, %v2020_v5  ;;  %v991_v52 = vsub.f32 %v2030_v18, %v990_v63 }
 0x118   :  { %v998_v16 = vand.u32 4294901760, %v997_v59  ;;  %v1010_v27 = vand.u32 4294901760, %v1009_v10  ;;  %v928_v20 = vand.u32 4294901760, %v927_v62  ;;  %v938_v37 = vsub.f32 %v2095_v4, %v937_v15 }
 0x119   :  { %v978_v46 = vand.u32 4294901760, %v2033_v19  ;;  %v2053_v55 = vsub.f32 %v788_v11, %v2035_v23  ;;  %854 = vmatprep.subr.mxu0 %v2035_v23  ;;  %v985_v51 = vsub.f32 %v2020_v5, %v984_v35  ;;  %v992_v56 = vand.u32 4294901760, %v991_v52 }
 0x11a   :  { %856 = vmatpush1.msra.mxu0 %v2022_v7  ;;  %v1016_v41 = vand.u32 4294901760, %v1015_v58  ;;  %v939_v44 = vand.u32 4294901760, %v938_v37 }
 0x11b   :  { %858 = vmatprep.subr.mxu0 %v2011_v36  ;;  %v972_v22 = vand.u32 4294901760, %v2053_v55  ;;  %v979_v1 = vsub.f32 %v2033_v19, %v978_v46  ;;  %v986_v61 = vand.u32 4294901760, %v985_v51 }
 0x11c   :  { %860 = vmatpush1.msra.mxu0 %v2009_v9 }
 0x11d   :  { %862 = vmatprep.subr.mxu0 %v2013_v43  ;;  %v973_v50 = vsub.f32 %v2053_v55, %v972_v22  ;;  %v980_v53 = vand.u32 4294901760, %v979_v1 }
 0x11e   :  { %864 = vmatpush1.msra.mxu0 %v2017_v45 }
 0x11f   :  { %866 = vmatprep.subr.mxu0 %v2024_v13  ;;  %v974_v57 = vand.u32 4294901760, %v973_v50 }
 0x120   :  { %868 = vmatpush1.msra.mxu0 %v2039_v29 }
 0x121   :  { %907 = vmatmul.mubr.f32.vlgmr.msra.gmra.mxu0 %v906_v39  ;;  %975 = vmatprep.subr.mxu1 %v974_v57 }
 0x122   :  { %1105 = vmatprep.subr.mxu0 %v2053_v55  ;;  %981 = vmatpush1.msra.mxu1 %v980_v53 }
 0x123   :  { %1108 = vmatpush1.msra.mxu0 %v2033_v19  ;;  %987 = vmatprep.subr.mxu1 %v986_v61 }
 0x124   :  { %1111 = vmatprep.subr.mxu0 %v2020_v5  ;;  %912 = vmatprep.mubr.f32.mxu0 %v1675_v0 }
 0x125   :  { %993 = vmatpush1.msra.mxu1 %v992_v56  ;;  %1114 = vmatpush1.msra.mxu0 %v2030_v18 }
 0x126   :  { %918 = vmatmul.mubr.f32.gmra.mxu0 %v917_v8  ;;  %999 = vmatprep.subr.mxu1 %v998_v16 }
 0x127   :  { %1117 = vmatprep.subr.mxu0 %v2042_v25  ;;  %1005 = vmatpush1.msra.mxu1 %v1004_v26 }
 0x128   :  { %1120 = vmatpush1.msra.mxu0 %v2049_v33  ;;  %1011 = vmatprep.subr.mxu1 %v1010_v27 }
 0x129   :  { %1123 = vmatprep.subr.mxu0 %v2058_v40  ;;  %923 = vmatprep.mubr.f32.mxu0 %v1675_v0 }
 0x12a   :  { %1017 = vmatpush1.msra.mxu1 %v1016_v41  ;;  %1126 = vmatpush1.msra.mxu0 %v2071_v54 }
 0x12b   :  { %929 = vmatmul.mubr.f32.gmra.mxu0 %v928_v20  ;;  %1052 = vmatmul.mubr.f32.vlgmr.msra.gmra.mxu1 %v2001_v6 }
 0x12c   :  { %1217 = vmatprep.subr.mxu1 %v2035_v23  ;;  %1328 = vmatprep.subr.mxu0 %v972_v22 }
 0x12d   :  { %1219 = vmatpush1.msra.mxu1 %v2022_v7  ;;  %934 = vmatprep.mubr.f32.mxu0 %v1675_v0 }
 0x12e   :  { %1221 = vmatprep.subr.mxu1 %v2011_v36  ;;  %1057 = vmatprep.mubr.f32.mxu1 %v1675_v0 }
 0x12f   :  { %1223 = vmatpush1.msra.mxu1 %v2009_v9  ;;  %940 = vmatmul.mubr.f32.gmra.mxu0 %v939_v44 }
 0x130   :  { %1059 = vmatmul.mubr.f32.gmra.mxu1 %v2007_v30  ;;  %1225 = vmatprep.subr.mxu1 %v2013_v43 }
 0x131   :  { %1227 = vmatpush1.msra.mxu1 %v2017_v45  ;;  %1064 = vmatprep.mubr.f32.mxu1 %v1675_v0 }
 0x132   :  { %1229 = vmatprep.subr.mxu1 %v2024_v13  ;;  %1159 = vmatprep.mubr.f32.mxu0 %v1675_v0 }
 0x133   :  { %1231 = vmatpush1.msra.mxu1 %v2039_v29  ;;  %1162 = vmatmul.mubr.f32.vlgmr.msra.gmra.mxu0 %v2005_v14 }
 0x134   :  { %1066 = vmatmul.mubr.f32.gmra.mxu1 %v2037_v28  ;;  %1332 = vmatpush1.msra.mxu0 %v978_v46 }
 0x135   :  { %1443 = vmatprep.subr.mxu1 %v2035_v23  ;;  %1336 = vmatprep.subr.mxu0 %v984_v35 }
 0x136   :  { %1340 = vmatpush1.msra.mxu0 %v990_v63  ;;  %1071 = vmatprep.mubr.f32.mxu1 %v1675_v0  ;;  %v800_v63 = vpop.permute.xlu0 %799 }
 0x137   :  { %1167 = vmatprep.mubr.f32.mxu0 %v1675_v0  ;;  %1344 = vmatprep.subr.mxu0 %v996_v2 }
 0x138   :  { %1073 = vmatmul.mubr.f32.gmra.mxu1 %v2068_v48  ;;  %1170 = vmatmul.mubr.f32.gmra.mxu0 %v2027_v17 }
 0x139   :  { %1348 = vmatpush1.msra.mxu0 %v1002_v32  ;;  %1175 = vmatprep.mubr.f32.mxu0 %v1675_v0 }
 0x13a   :  { %1352 = vmatprep.subr.mxu0 %v1008_v49  ;;  %1264 = vmatprep.mubr.f32.mxu1 %v1675_v0  ;;  %v810_v57 = vpop.permute.xlu0 %809 }
 0x13b   :  { %1356 = vmatpush1.msra.mxu0 %v1014_v42 }
 0x13c   :  { %1178 = vmatmul.mubr.f32.gmra.mxu0 %v2066_v38  ;;  %1268 = vmatmul.mubr.f32.vlgmr.msra.gmra.mxu1 %v904_v21 }
 0x13d   :  { %1445 = vmatpush1.msra.mxu1 %v2022_v7  ;;  %1183 = vmatprep.mubr.f32.mxu0 %v1675_v0 }
 0x13e   :  { %1447 = vmatprep.subr.mxu1 %v2011_v36  ;;  %1273 = vmatprep.mubr.f32.mxu1 %v1675_v0 }
 0x13f   :  { %1449 = vmatpush1.msra.mxu1 %v2009_v9 }
 0x140   :  { %1451 = vmatprep.subr.mxu1 %v2013_v43  ;;  %1186 = vmatmul.mubr.f32.gmra.mxu0 %v2095_v4 }
 0x141   :  { %1277 = vmatmul.mubr.f32.gmra.mxu1 %v915_v60  ;;  %1389 = vmatprep.mubr.f32.mxu0 %v1675_v0 }
 0x142   :  { %1453 = vmatpush1.msra.mxu1 %v2017_v45  ;;  %1282 = vmatprep.mubr.f32.mxu1 %v1675_v0 }
 0x143   :  { %1455 = vmatprep.subr.mxu1 %v2024_v13 }
 0x144   :  { %1457 = vmatpush1.msra.mxu1 %v2039_v29  ;;  %1391 = vmatmul.mubr.f32.vlgmr.msra.gmra.mxu0 %v2001_v6 }
 0x145   :  { %1286 = vmatmul.mubr.f32.gmra.mxu1 %v926_v3  ;;  %1396 = vmatprep.mubr.f32.mxu0 %v1675_v0 }
 0x146   :  { %1291 = vmatprep.mubr.f32.mxu1 %v1675_v0 }
 0x148   :  { %1398 = vmatmul.mubr.f32.gmra.mxu0 %v2007_v30 }
 0x149   :  { %1295 = vmatmul.mubr.f32.gmra.mxu1 %v937_v15  ;;  %1403 = vmatprep.mubr.f32.mxu0 %v1675_v0 }
 0x14a   :  { %1490 = vmatprep.mubr.f32.mxu1 %v1675_v0 }
 0x14c   :  { %1405 = vmatmul.mubr.f32.gmra.mxu0 %v2037_v28 }
 0x14d   :  { %1492 = vmatmul.mubr.f32.vlgmr.msra.gmra.mxu1 %v2001_v6  ;;  %1410 = vmatprep.mubr.f32.mxu0 %v1675_v0 }
 0x14e   :  { %1497 = vmatprep.mubr.f32.mxu1 %v1675_v0 }
 0x150   :  { %1412 = vmatmul.mubr.f32.gmra.mxu0 %v2068_v48 }
 0x151   :  { %1499 = vmatmul.mubr.f32.gmra.mxu1 %v2007_v30 }
 0x152   :  { %1504 = vmatprep.mubr.f32.mxu1 %v1675_v0 }
 0x155   :  { %1506 = vmatmul.mubr.f32.gmra.mxu1 %v2037_v28 }
 0x156   :  { %1511 = vmatprep.mubr.f32.mxu1 %v1675_v0 }
 0x159   :  { %1513 = vmatmul.mubr.f32.gmra.mxu1 %v2068_v48  ;;  %v805_v48 = vpop.permute.xlu1 %804 }
 0x15d   :  { %v815_v62 = vpop.permute.xlu1 %814 }
 0x1e1   :  { %v908_v14 = vpop.f32.mrf.mxu0 }
 0x1e2   :  { %v909_v54 = vadd.f32 %v908_v14, %v800_v63 }
 0x1e3   :  { %v910_v9 = vpop.f32.mrf.mxu0 }
 0x1e4   :  { %v911_v39 = vadd.f32 %v910_v9, %v800_v63 }
 0x1e6   :  { %v919_v36 = vpop.f32.mrf.mxu0 }
 0x1e7   :  { %v920_v2 = vadd.f32 %v919_v36, %v805_v48 }
 0x1e8   :  { %v921_v6 = vpop.f32.mrf.mxu0 }
 0x1e9   :  { %v922_v34 = vadd.f32 %v921_v6, %v805_v48 }
 0x1eb   :  { %v930_v43 = vpop.f32.mrf.mxu0  ;;  %v1053_v21 = vpop.f32.mrf.mxu1 }
 0x1ec   :  { %v1054_v50 = vadd.f32 %v1053_v21, %v909_v54  ;;  %v931_v53 = vadd.f32 %v930_v43, %v810_v57 }
 0x1ed   :  { %v932_v45 = vpop.f32.mrf.mxu0  ;;  %v1055_v5 = vpop.f32.mrf.mxu1 }
 0x1ee   :  { %v1056_v3 = vadd.f32 %v1055_v5, %v911_v39  ;;  %v933_v15 = vadd.f32 %v932_v45, %v810_v57 }
 0x1ef   :  { %v941_v7 = vpop.f32.mrf.mxu0 }
 0x1f0   :  { %v1060_v11 = vpop.f32.mrf.mxu1  ;;  %v942_v20 = vadd.f32 %v941_v7, %v815_v62 }
 0x1f1   :  { %v943_v12 = vpop.f32.mrf.mxu0  ;;  %v1061_v49 = vadd.f32 %v1060_v11, %v920_v2  ;;  %v1539_v2 = vpop.permute.xlu1 %1538 }
 0x1f2   :  { %v1062_v30 = vpop.f32.mrf.mxu1  ;;  %v944_v43 = vadd.f32 %v943_v12, %v815_v62 }
 0x1f3   :  { %v1163_v13 = vpop.f32.mrf.mxu0  ;;  %v1063_v59 = vadd.f32 %v1062_v30, %v922_v34 }
 0x1f4   :  { %v1067_v17 = vpop.f32.mrf.mxu1  ;;  %v1164_v4 = vadd.f32 %v1163_v13, %v1054_v50 }
 0x1f5   :  { %v1165_v18 = vpop.f32.mrf.mxu0  ;;  %v1068_v58 = vadd.f32 %v1067_v17, %v931_v53 }
 0x1f6   :  { %v1069_v19 = vpop.f32.mrf.mxu1  ;;  %v1166_v8 = vadd.f32 %v1165_v18, %v1056_v3 }
 0x1f7   :  { %v1070_v14 = vadd.f32 %v1069_v19, %v933_v15 }
 0x1f8   :  { %v1074_v23 = vpop.f32.mrf.mxu1  ;;  %v1171_v0 = vpop.f32.mrf.mxu0 }
 0x1f9   :  { %v1172_v47 = vadd.f32 %v1171_v0, %v1061_v49  ;;  %v1075_v21 = vadd.f32 %v1074_v23, %v942_v20 }
 0x1fa   :  { %v1076_v28 = vpop.f32.mrf.mxu1  ;;  %v1173_v29 = vpop.f32.mrf.mxu0 }
 0x1fb   :  { %v1174_v16 = vadd.f32 %v1173_v29, %v1063_v59  ;;  %v1534_v29 = vpop.permute.xlu0 %1533 }
 0x1fc   :  { %v1179_v25 = vpop.f32.mrf.mxu0  ;;  %v1269_v24 = vpop.f32.mrf.mxu1 }
 0x1fd   :  { %v1270_v10 = vadd.f32 %v1269_v24, %v1164_v4  ;;  %v1180_v9 = vadd.f32 %v1179_v25, %v1068_v58  ;;  %v1077_v24 = vadd.f32 %v1076_v28, %v944_v43 }
 0x1fe   :  { %v1181_v31 = vpop.f32.mrf.mxu0  ;;  %v1271_v33 = vpop.f32.mrf.mxu1 }
 0x1ff   :  { %v1272_v37 = vadd.f32 %v1271_v33, %v1166_v8  ;;  %v1182_v13 = vadd.f32 %v1181_v31, %v1070_v14 }
 0x200   :  { %v1187_v46 = vpop.f32.mrf.mxu0 }
 0x201   :  { %v1278_v55 = vpop.f32.mrf.mxu1  ;;  %v1188_v7 = vadd.f32 %v1187_v46, %v1075_v21  ;;  %v1677_v21 = vmov 1966171168  }
 0x202   :  { %v1189_v35 = vpop.f32.mrf.mxu0  ;;  %v1279_v26 = vadd.f32 %v1278_v55, %v1172_v47 }
 0x203   :  { %v1280_v40 = vpop.f32.mrf.mxu1  ;;  %v1190_v63 = vadd.f32 %v1189_v35, %v1077_v24 }
 0x204   :  { %v1392_v60 = vpop.f32.mrf.mxu0  ;;  %v1281_v36 = vadd.f32 %v1280_v40, %v1174_v16 }
 0x205   :  { %v1287_v22 = vpop.f32.mrf.mxu1  ;;  %v1393_v41 = vadd.f32 %v1392_v60, %v1270_v10 }
 0x206   :  { %v1394_v38 = vpop.f32.mrf.mxu0  ;;  %v1288_v18 = vadd.f32 %v1287_v22, %v1180_v9 }
 0x207   :  { %v1289_v1 = vpop.f32.mrf.mxu1  ;;  %v1395_v5 = vadd.f32 %v1394_v38, %v1272_v37 }
 0x208   :  { %v1399_v32 = vpop.f32.mrf.mxu0  ;;  %v1290_v60 = vadd.f32 %v1289_v1, %v1182_v13  ;;  %v1544_v1 = vpop.permute.xlu0 %1543 }
 0x209   :  { %v1296_v51 = vpop.f32.mrf.mxu1  ;;  %v1400_v6 = vadd.f32 %v1399_v32, %v1279_v26 }
 0x20a   :  { %v1401_v52 = vpop.f32.mrf.mxu0  ;;  %v1297_v38 = vadd.f32 %v1296_v51, %v1188_v7 }
 0x20b   :  { %v1298_v42 = vpop.f32.mrf.mxu1  ;;  %v1402_v45 = vadd.f32 %v1401_v52, %v1281_v36 }
 0x20c   :  { %v1406_v61 = vpop.f32.mrf.mxu0  ;;  %v1299_v32 = vadd.f32 %v1298_v42, %v1190_v63 }
 0x20d   :  { %v1493_v56 = vpop.f32.mrf.mxu1  ;;  %v1407_v19 = vadd.f32 %v1406_v61, %v1288_v18 }
 0x20e   :  { %v1408_v27 = vpop.f32.mrf.mxu0  ;;  %v1494_v11 = vadd.f32 %v1493_v56, %v1393_v41  ;;  %v1549_v56 = vpop.permute.xlu1 %1548 }
 0x20f   :  { %v1495_v44 = vpop.f32.mrf.mxu1  ;;  %v1409_v48 = vadd.f32 %v1408_v27, %v1290_v60 }
 0x210   :  { %v1413_v17 = vpop.f32.mrf.mxu0  ;;  %v1496_v33 = vadd.f32 %v1495_v44, %v1395_v5  ;;  %v1519_v12 = vmax.f32 %v1494_v11, 0.0  ;;  %v1585_v5 = vunpack.c.l.s4 %v1677_v21  ;;  %v1587_v11 = vlaneseq }
 0x211   :  { %v1500_v30 = vpop.f32.mrf.mxu1  ;;  %v1414_v28 = vadd.f32 %v1413_v17, %v1297_v38 }
 0x212   :  { %v1501_v0 = vadd.f32 %v1500_v30, %v1400_v6  ;;  %v1415_v54 = vpop.f32.mrf.mxu0  ;;  %v1520_v39 = vmax.f32 %v1496_v33, 0.0  ;;  %v1551_v52 = vmul.f32 %v1534_v29, %v1519_v12  ;;  %v1586_v17 = vunpack.c.0.s8 %v1585_v5 }
 0x213   :  { %v1502_v55 = vpop.f32.mrf.mxu1  ;;  %v1416_v57 = vadd.f32 %v1415_v54, %v1299_v32  ;;  %vm1601_vm1 = vcmp.lt.s32.totalorder %v1587_v11, 256 }
 0x214   :  { %v1521_v25 = vmax.f32 %v1501_v0, 0.0  ;;  %v1503_v40 = vadd.f32 %v1502_v55, %v1402_v45  ;;  %v1552_v59 = vmul.f32 %v1534_v29, %v1520_v39  ;;  %v1588_v0 = vshrl.u32 %v1587_v11, 7 }
 0x215   :  { %v1507_v23 = vpop.f32.mrf.mxu1  ;;  %v1578_v29 = vstv %s2214_s6 }
 0x216   :  { %v1522_v31 = vmax.f32 %v1503_v40, 0.0  ;;  %v1508_v22 = vadd.f32 %v1507_v23, %v1407_v19  ;;  %v1553_v46 = vmul.f32 %v1539_v2, %v1521_v25  ;;  %v1589_v55 = vsub.s32 %v1586_v17, %v1588_v0 }
 0x217   :  { %v1509_v50 = vpop.f32.mrf.mxu1 }
 0x218   :  { %v1523_v34 = vmax.f32 %v1508_v22, 0.0  ;;  %v1510_v49 = vadd.f32 %v1509_v50, %v1409_v48  ;;  %v1554_v35 = vmul.f32 %v1539_v2, %v1522_v31  ;;  %v1559_v61 = vadd.f32 %v1553_v46, %v1551_v52 }
 0x219   :  { %v1514_v3 = vpop.f32.mrf.mxu1 }
 0x21a   :  { %v1555_v4 = vmul.f32 %v1544_v1, %v1523_v34  ;;  %v1524_v53 = vmax.f32 %v1510_v49, 0.0  ;;  %v1515_v51 = vadd.f32 %v1514_v3, %v1414_v28  ;;  %v1568_v62 = vadd.f32 %v1554_v35, %v1552_v59 }
 0x21b   :  { %v1516_v47 = vpop.f32.mrf.mxu1 }
 0x21c   :  { %v1556_v8 = vmul.f32 %v1544_v1, %v1524_v53  ;;  %v1525_v10 = vmax.f32 %v1515_v51, 0.0  ;;  %v1517_v42 = vadd.f32 %v1516_v47, %v1416_v57  ;;  %v1560_v15 = vadd.f32 %v1559_v61, %v1555_v4 }
 0x21e   :  { %v1557_v58 = vmul.f32 %v1549_v56, %v1525_v10  ;;  %v1526_v16 = vmax.f32 %v1517_v42, 0.0  ;;  %v1569_v26 = vadd.f32 %v1568_v62, %v1556_v8 }
 0x220   :  { %v1561_v27 = vadd.f32 %v1560_v15, %v1557_v58  ;;  %v1558_v20 = vmul.f32 %v1549_v56, %v1526_v16 }
 0x222   :  { %v1562_v37 = vrot.slane %v1561_v27, 4  ;;  %v1570_v41 = vadd.f32 %v1569_v26, %v1558_v20 }
 0x224   :  { %v1563_v44 = vadd.f32 %v1562_v37, %v1561_v27  ;;  %v1571_v14 = vrot.slane %v1570_v41, 4 }
 0x226   :  { %v1564_v9 = vrot.slane %v1563_v44, 2  ;;  %v1572_v36 = vadd.f32 %v1571_v14, %v1570_v41 }
 0x228   :  { %v1565_v6 = vadd.f32 %v1564_v9, %v1563_v44  ;;  %v1573_v43 = vrot.slane %v1572_v36, 2 }
 0x22a   :  { %v1566_v30 = vrot.slane %v1565_v6, 1  ;;  %v1574_v13 = vadd.f32 %v1573_v43, %v1572_v36 }
 0x22c   :  { %v1567_v18 = vadd.f32 %v1566_v30, %v1565_v6  ;;  %v1575_v45 = vrot.slane %v1574_v13, 1 }
 0x22e   :  { %v1576_v24 = vadd.f32 %v1575_v45, %v1574_v13  ;;  %v1579_v7 = vadd.f32 %v1578_v29, %v1567_v18 }
 0x230   :  { %v1580_v33 = vadd.f32 %v1578_v29, %v1576_v24 }
 0x232   :  { %v1583_v60 = vcombine.low %v1579_v7, %v1580_v33 }
 0x234   :  { %v1590_v19 = vrot.slane %v1583_v60, %v1589_v55 }
 0x236   :  { %v1597_v25 = vrot.slane %v1590_v19, %v1589_v55 }
 0x238   :  { %1603 = vst.msk [vmem:[#allocation6] sm:$0x3] %vm1601_vm1, %v1597_v25 }
 0x239   :  { %1659 = shalt.err (!%p1656_p9)
}
 0x23a   :  { %1613 = dma.vmem_to_hbm [thread:$0]  %s1611_s28, 32, %s2215_s7, [#allocation5]  }
 0x23b   :  { %1670 = dma.done.wait [#allocation5], 32  }
 0x23c   :  { %1671 = vsyncadd [#allocation5], 4294967264 }
 0x23d   :  { %1617 = vsyncpa [#allocation4], 1 }
 0x23e   :  { %1618 = vsyncpa [#allocation5], 1 }

</bundles_post_ra>
